<compile_context>
chip_gen: v6e
topology: v6e:2x2x1
jax: 0.10.0
libtpu: 0.0.40
codegen_flags: <defaults>
</compile_context>

<pallas_src>
import functools

import jax
import jax.numpy as jnp
from jax.experimental import pallas as pl
from jax.experimental.pallas import tpu as pltpu  # noqa: F401

LATENT_DIM = 32
HIDDEN_DIM = 128      # padded 64 -> 128: lane/MXU aligned, hardware pads anyway
C, H, W = 4, 16, 16
IMG_DIM = C * H * W   # 1024
D_OUT_PAD = 128       # lane-dense discriminator output block; logit is column 0

# packed-bias column offsets (all multiples of 128 -> lane-aligned static slices)
_B_GB1 = 0
_B_GB2 = _B_GB1 + HIDDEN_DIM            # 128
_B_DB1 = _B_GB2 + IMG_DIM               # 1152
_B_DB2 = _B_DB1 + HIDDEN_DIM            # 1280
BIAS_PACK_DIM = _B_DB2 + D_OUT_PAD      # 1408


# ----------------------------- Pallas kernel --------------------------------

def _gan_fused_kernel(z_ref, x_ref,
                      g_w1_ref, g_w2_ref, d_w1_ref, d_w2_ref,
                      bias_ref,
                      gen_ref, d_ref):
    """Fused generator + discriminator forward.

    z_ref:    (2B, LATENT)        f32  -- [z1; z2]
    x_ref:    (B,  IMG_DIM)       f32  -- flattened real batch
    bias_ref: (1,  BIAS_PACK_DIM) f32  -- [g_b1 | g_b2 | d_b1 | d_b2(pad 128)]
    gen_ref:  (B,  IMG_DIM)       f32  -- generated images for z1 only
    d_ref:    (3B, 128)           f32  -- D([G(z1); real; G(z2)]), lane-dense
    """
    B = x_ref.shape[0]

    # static, lane-aligned slices of the packed bias row (free)
    g_b1 = bias_ref[:, _B_GB1:_B_GB2]
    g_b2 = bias_ref[:, _B_GB2:_B_DB1]
    d_b1 = bias_ref[:, _B_DB1:_B_DB2]
    d_b2 = bias_ref[:, _B_DB2:BIAS_PACK_DIM]

    # ---------------- Generator (both latent draws at once) -----------------
    zb = z_ref[...].astype(jnp.bfloat16)
    h = jnp.dot(zb, g_w1_ref[...], preferred_element_type=jnp.float32)
    h = jnp.maximum(h + g_b1, 0.0)                                   # ReLU (f32)
    g = jnp.dot(h.astype(jnp.bfloat16), g_w2_ref[...],
                preferred_element_type=jnp.float32)
    gen = jnp.tanh(g + g_b2)                                         # (2B, IMG_DIM) f32

    # Only the z1 images are consumed by the wrapper -> only those hit HBM.
    gen_ref[...] = gen[0:B, :]

    # ---------------- Discriminator: ONE stacked pass, torch row order ------
    # rows: [0:B] = D(G(z1)), [B:2B] = D(real), [2B:3B] = D(G(z2))
    x_stack = jnp.concatenate([gen[0:B, :], x_ref[...], gen[B:2 * B, :]], axis=0)
    hd = jnp.dot(x_stack.astype(jnp.bfloat16), d_w1_ref[...],
                 preferred_element_type=jnp.float32)
    hd = hd + d_b1
    hd = jnp.where(hd > 0.0, hd, 0.2 * hd)                           # LeakyReLU(0.2)
    o = jnp.dot(hd.astype(jnp.bfloat16), d_w2_ref[...],
                preferred_element_type=jnp.float32)
    d_ref[...] = jax.nn.sigmoid(o + d_b2)                            # single unmasked store


# ------------------------------ Model wrapper --------------------------------

def init_params(key):
    ks = jax.random.split(key, 8)
    scale = 0.05
    g_w1 = scale * jax.random.normal(ks[0], (LATENT_DIM, HIDDEN_DIM), jnp.float32)
    g_b1 = scale * jax.random.normal(ks[1], (HIDDEN_DIM,), jnp.float32)
    g_w2 = scale * jax.random.normal(ks[2], (HIDDEN_DIM, IMG_DIM), jnp.float32)
    g_b2 = scale * jax.random.normal(ks[3], (IMG_DIM,), jnp.float32)
    d_w1 = scale * jax.random.normal(ks[4], (IMG_DIM, HIDDEN_DIM), jnp.float32)
    d_b1 = scale * jax.random.normal(ks[5], (HIDDEN_DIM,), jnp.float32)
    d_w2 = scale * jax.random.normal(ks[6], (HIDDEN_DIM, 1), jnp.float32)
    d_b2 = scale * jax.random.normal(ks[7], (1,), jnp.float32)

    # Kernel-ready layout (done once, not per forward):
    #  - matmul weights in bf16 (halves weight DMA bytes; f32 accumulation in-kernel)
    #  - the four bias rows packed into ONE (1, BIAS_PACK_DIM) f32 input
    #  - discriminator head padded to 128 output columns for a lane-dense store;
    #    only column 0 carries the real Linear(HIDDEN, 1) weight/bias.
    d_b2_pad = jnp.pad(d_b2, (0, D_OUT_PAD - 1))
    bias_pack = jnp.concatenate([g_b1, g_b2, d_b1, d_b2_pad]).reshape(1, BIAS_PACK_DIM)
    return {
        "g_w1": g_w1.astype(jnp.bfloat16),
        "g_w2": g_w2.astype(jnp.bfloat16),
        "d_w1": d_w1.astype(jnp.bfloat16),
        "d_w2": jnp.pad(d_w2, ((0, 0), (0, D_OUT_PAD - 1))).astype(jnp.bfloat16),
        "bias_pack": bias_pack.astype(jnp.float32),
    }


@functools.partial(jax.jit)
def gan_forward(params, batch, rng):
    """Mirror of GAN.forward:
       - sample latents, generate images
       - discriminate concat([generated, real])
       - sample fresh latents, discriminate newly generated images
       All generator/discriminator work happens in a single pallas_call.
    """
    batch_size = batch.shape[0]
    # Both latent draws sampled in one RNG op (rows [0:B] = z1, [B:2B] = z2).
    z = jax.random.normal(rng, (2 * batch_size, LATENT_DIM), jnp.float32)
    x_flat = batch.reshape(batch_size, IMG_DIM)           # (B, IMG_DIM)

    full = lambda a: pl.BlockSpec(a.shape, lambda: (0,) * a.ndim)

    bf2, f4 = 2, 4
    bytes_accessed = (
        z.size * f4 + x_flat.size * f4
        + params["g_w1"].size * bf2 + params["g_w2"].size * bf2
        + params["d_w1"].size * bf2 + params["d_w2"].size * bf2
        + params["bias_pack"].size * f4
        + batch_size * IMG_DIM * f4                       # gen output
        + 3 * batch_size * D_OUT_PAD * f4                 # d output
    )
    cost = pl.CostEstimate(
        flops=2 * (2 * batch_size * LATENT_DIM * HIDDEN_DIM
                   + 2 * batch_size * HIDDEN_DIM * IMG_DIM
                   + 3 * batch_size * IMG_DIM * HIDDEN_DIM
                   + 3 * batch_size * HIDDEN_DIM * D_OUT_PAD),
        transcendentals=2 * batch_size * IMG_DIM + 3 * batch_size * D_OUT_PAD,
        bytes_accessed=bytes_accessed,
    )

    # Tiny footprint (< 1 MiB weights + activations): whole-array blocks, no grid.
    # TODO(synk): if batch grows (>=512 rows), add a batch grid axis with
    # dimension_semantics=("parallel",) (both v7x TensorCores) and size the row
    # tile so buffers fit v7x's 64 MiB VMEM (v5e/v6e can go ~2x bigger).
    gen_flat, d_out = pl.pallas_call(
        _gan_fused_kernel,
        out_shape=(
            jax.ShapeDtypeStruct((batch_size, IMG_DIM), jnp.float32),
            jax.ShapeDtypeStruct((3 * batch_size, D_OUT_PAD), jnp.float32),
        ),
        in_specs=[full(z), full(x_flat),
                  full(params["g_w1"]), full(params["g_w2"]),
                  full(params["d_w1"]), full(params["d_w2"]),
                  full(params["bias_pack"])],
        out_specs=(
            pl.BlockSpec((batch_size, IMG_DIM), lambda: (0, 0)),
            pl.BlockSpec((3 * batch_size, D_OUT_PAD), lambda: (0, 0)),
        ),
        cost_estimate=cost,
    )(z, x_flat,
      params["g_w1"], params["g_w2"], params["d_w1"], params["d_w2"],
      params["bias_pack"])

    generated_images = gen_flat.reshape(batch_size, C, H, W)
    discr_preds = d_out[:2 * batch_size, 0:1]              # D([G(z1); real])
    gen_preds = d_out[2 * batch_size:3 * batch_size, 0:1]  # D(G(z2))

    return {
        "generated_images": generated_images,
        "gen_preds": gen_preds,
        "discr_preds": discr_preds,
    }


# ---------------------------------- main -------------------------------------

if __name__ == "__main__":
    key = jax.random.PRNGKey(0)
    k_params, k_batch, k_fwd = jax.random.split(key, 3)

    params = init_params(k_params)
    batch = jax.random.normal(k_batch, (2, C, H, W), jnp.float32)  # NCHW

    out = gan_forward(params, batch, k_fwd)
    out = jax.block_until_ready(out)

    assert out["generated_images"].shape == (2, C, H, W)
    assert out["discr_preds"].shape == (4, 1)
    assert out["gen_preds"].shape == (2, 1)
    assert bool(jnp.all(jnp.isfinite(out["generated_images"])))
    assert bool(jnp.all((out["discr_preds"] >= 0) & (out["discr_preds"] <= 1)))
    assert bool(jnp.all((out["gen_preds"] >= 0) & (out["gen_preds"] <= 1)))

    print("KERNEL_OK")
</pallas_src>

<mosaic_0001>
module attributes {stable_mosaic.version = 11 : i64} {
  func.func @_gan_fused_kernel(%arg0: memref<4x32xf32, #tpu.memory_space<vmem>>, %arg1: memref<2x1024xf32, #tpu.memory_space<vmem>>, %arg2: memref<32x128xbf16, #tpu.memory_space<vmem>>, %arg3: memref<128x1024xbf16, #tpu.memory_space<vmem>>, %arg4: memref<1024x128xbf16, #tpu.memory_space<vmem>>, %arg5: memref<128x128xbf16, #tpu.memory_space<vmem>>, %arg6: memref<1x1408xf32, #tpu.memory_space<vmem>>, %arg7: memref<2x1024xf32, #tpu.memory_space<vmem>>, %arg8: memref<6x128xf32, #tpu.memory_space<vmem>>) attributes {dimension_semantics = [], scalar_prefetch = 0 : i64, scratch_operands = 0 : i64, tpu.core_type = #tpu.core_type<tc>} {
    %c0 = arith.constant 0 : index
    %c0_0 = arith.constant 0 : index
    %0 = vector.load %arg6[%c0, %c0_0] : memref<1x1408xf32, #tpu.memory_space<vmem>>, vector<1x128xf32>
    %c0_1 = arith.constant 0 : index
    %c128 = arith.constant 128 : index
    %1 = vector.load %arg6[%c0_1, %c128] : memref<1x1408xf32, #tpu.memory_space<vmem>>, vector<1x1024xf32>
    %c0_2 = arith.constant 0 : index
    %c1152 = arith.constant 1152 : index
    %2 = vector.load %arg6[%c0_2, %c1152] : memref<1x1408xf32, #tpu.memory_space<vmem>>, vector<1x128xf32>
    %c0_3 = arith.constant 0 : index
    %c1280 = arith.constant 1280 : index
    %3 = vector.load %arg6[%c0_3, %c1280] : memref<1x1408xf32, #tpu.memory_space<vmem>>, vector<1x128xf32>
    %c0_4 = arith.constant 0 : index
    %c0_5 = arith.constant 0 : index
    %4 = vector.load %arg0[%c0_4, %c0_5] : memref<4x32xf32, #tpu.memory_space<vmem>>, vector<4x32xf32>
    %5 = arith.truncf %4 : vector<4x32xf32> to vector<4x32xbf16>
    %c0_6 = arith.constant 0 : index
    %c0_7 = arith.constant 0 : index
    %6 = vector.load %arg2[%c0_6, %c0_7] : memref<32x128xbf16, #tpu.memory_space<vmem>>, vector<32x128xbf16>
    %cst = arith.constant dense<0.000000e+00> : vector<4x128xf32>
    %7 = tpu.matmul %5, %6, %cst {dimension_numbers = #tpu.dot_dimension_numbers<[1], [0], [0], [1], [0, 0, 1, 1], [], []>} : vector<4x32xbf16>, vector<32x128xbf16>, vector<4x128xf32> -> vector<4x128xf32>
    %8 = vector.broadcast %0 : vector<1x128xf32> to vector<4x128xf32>
    %9 = arith.addf %7, %8 : vector<4x128xf32>
    %cst_8 = arith.constant 0.000000e+00 : f32
    %10 = vector.broadcast %cst_8 : f32 to vector<4x128xf32>
    %11 = arith.maximumf %9, %10 : vector<4x128xf32>
    %12 = arith.truncf %11 : vector<4x128xf32> to vector<4x128xbf16>
    %c0_9 = arith.constant 0 : index
    %c0_10 = arith.constant 0 : index
    %13 = vector.load %arg3[%c0_9, %c0_10] : memref<128x1024xbf16, #tpu.memory_space<vmem>>, vector<128x1024xbf16>
    %cst_11 = arith.constant dense<0.000000e+00> : vector<4x1024xf32>
    %14 = tpu.matmul %12, %13, %cst_11 {dimension_numbers = #tpu.dot_dimension_numbers<[1], [0], [0], [1], [0, 0, 1, 1], [], []>} : vector<4x128xbf16>, vector<128x1024xbf16>, vector<4x1024xf32> -> vector<4x1024xf32>
    %15 = vector.broadcast %1 : vector<1x1024xf32> to vector<4x1024xf32>
    %16 = arith.addf %14, %15 : vector<4x1024xf32>
    %17 = math.tanh %16 : vector<4x1024xf32>
    %18 = vector.extract_strided_slice %17 {offsets = [0, 0], sizes = [2, 1024], strides = [1, 1]} : vector<4x1024xf32> to vector<2x1024xf32>
    %c0_12 = arith.constant 0 : index
    %c0_13 = arith.constant 0 : index
    %19 = vector.load %arg7[%c0_12, %c0_13] : memref<2x1024xf32, #tpu.memory_space<vmem>>, vector<2x1024xf32>
    tpu.vector_store %arg7[%c0_12, %c0_13], %18 {strides = array<i32>} : memref<2x1024xf32, #tpu.memory_space<vmem>>, vector<2x1024xf32>,
    %20 = vector.extract_strided_slice %17 {offsets = [0, 0], sizes = [2, 1024], strides = [1, 1]} : vector<4x1024xf32> to vector<2x1024xf32>
    %c0_14 = arith.constant 0 : index
    %c0_15 = arith.constant 0 : index
    %21 = vector.load %arg1[%c0_14, %c0_15] : memref<2x1024xf32, #tpu.memory_space<vmem>>, vector<2x1024xf32>
    %22 = vector.extract_strided_slice %17 {offsets = [2, 0], sizes = [2, 1024], strides = [1, 1]} : vector<4x1024xf32> to vector<2x1024xf32>
    %23 = tpu.concatenate %20, %21, %22 in 0 : vector<2x1024xf32>, vector<2x1024xf32>, vector<2x1024xf32> -> vector<6x1024xf32>
    %24 = arith.truncf %23 : vector<6x1024xf32> to vector<6x1024xbf16>
    %c0_16 = arith.constant 0 : index
    %c0_17 = arith.constant 0 : index
    %25 = vector.load %arg4[%c0_16, %c0_17] : memref<1024x128xbf16, #tpu.memory_space<vmem>>, vector<1024x128xbf16>
    %cst_18 = arith.constant dense<0.000000e+00> : vector<6x128xf32>
    %26 = tpu.matmul %24, %25, %cst_18 {dimension_numbers = #tpu.dot_dimension_numbers<[1], [0], [0], [1], [0, 0, 1, 1], [], []>} : vector<6x1024xbf16>, vector<1024x128xbf16>, vector<6x128xf32> -> vector<6x128xf32>
    %27 = vector.broadcast %2 : vector<1x128xf32> to vector<6x128xf32>
    %28 = arith.addf %26, %27 : vector<6x128xf32>
    %cst_19 = arith.constant 0.000000e+00 : f32
    %29 = vector.broadcast %cst_19 : f32 to vector<6x128xf32>
    %30 = arith.cmpf ogt, %28, %29 : vector<6x128xf32>
    %cst_20 = arith.constant 2.000000e-01 : f32
    %31 = vector.broadcast %cst_20 : f32 to vector<6x128xf32>
    %32 = arith.mulf %31, %28 : vector<6x128xf32>
    %33 = arith.select %30, %28, %32 : vector<6x128xi1>, vector<6x128xf32>
    %34 = arith.truncf %33 : vector<6x128xf32> to vector<6x128xbf16>
    %c0_21 = arith.constant 0 : index
    %c0_22 = arith.constant 0 : index
    %35 = vector.load %arg5[%c0_21, %c0_22] : memref<128x128xbf16, #tpu.memory_space<vmem>>, vector<128x128xbf16>
    %cst_23 = arith.constant dense<0.000000e+00> : vector<6x128xf32>
    %36 = tpu.matmul %34, %35, %cst_23 {dimension_numbers = #tpu.dot_dimension_numbers<[1], [0], [0], [1], [0, 0, 1, 1], [], []>} : vector<6x128xbf16>, vector<128x128xbf16>, vector<6x128xf32> -> vector<6x128xf32>
    %37 = vector.broadcast %3 : vector<1x128xf32> to vector<6x128xf32>
    %38 = arith.addf %36, %37 : vector<6x128xf32>
    %39 = arith.negf %38 : vector<6x128xf32>
    %40 = math.exp %39 : vector<6x128xf32>
    %cst_24 = arith.constant 1.000000e+00 : f32
    %41 = vector.broadcast %cst_24 : f32 to vector<6x128xf32>
    %42 = arith.addf %41, %40 : vector<6x128xf32>
    %43 = arith.divf %41, %42 : vector<6x128xf32>
    %c0_25 = arith.constant 0 : index
    %c0_26 = arith.constant 0 : index
    %44 = vector.load %arg8[%c0_25, %c0_26] : memref<6x128xf32, #tpu.memory_space<vmem>>, vector<6x128xf32>
    tpu.vector_store %arg8[%c0_25, %c0_26], %43 {strides = array<i32>} : memref<6x128xf32, #tpu.memory_space<vmem>>, vector<6x128xf32>,
    return
  }
}

</mosaic_0001>

<bundles_post_ra>
// kernel: gan_forward.1
= control target key start
LH: loop header
LB: loop body
LE: loop exit
PB: predicated region body
PF: predicated region fallthrough
CT: control target
= control target key end

     0   :  { %14 = vsyncpa [#allocation3], 0  ;;  %s2280_s0 = inlined_call_operand.vmem [shape: f32[4,32], index: 0, kind: input, shape index: {}]   ;;  %s2281_s1 = inlined_call_operand.vmem [shape: f32[2,1024], index: 1, kind: input, shape index: {}]   ;;  %s2282_s2 = inlined_call_operand.vmem [shape: bf16[32,128], index: 2, kind: input, shape index: {}]   ;;  %s2283_s3 = inlined_call_operand.hbm [shape: bf16[128,1024], index: 3, kind: input, shape index: {}]   ;;  %s2284_s4 = inlined_call_operand.hbm [shape: bf16[1024,128], index: 4, kind: input, shape index: {}]   ;;  %s2285_s5 = inlined_call_operand.vmem [shape: bf16[128,128], index: 5, kind: input, shape index: {}]   ;;  %s2286_s6 = inlined_call_operand.vmem [shape: f32[1,1408], index: 6, kind: input, shape index: {}]   ;;  %s2287_s7 = inlined_call_operand.vmem [shape: f32[2,1024], index: 7, kind: output, shape index: {0}]   ;;  %s2288_s8 = inlined_call_operand.vmem [shape: f32[6,128], index: 8, kind: output, shape index: {1}]  }
   0x1   :  { %15 = vsyncpa [#allocation5], 0  ;;  %s2092_s27 = smov [#allocation2]  }
   0x2   :  { %s27_s28 = sshll.u32 %s2092_s27, 4  ;;  %s28_s28 = int_to_ptr.vmem [resolvable:$true] %s27_s28 }
   0x3   :  { %s2056_s29 = scalar_lea.vmem %s28_s28, 8192  ;;  %p2061_p1 = scmp.lt.s32.totalorder %s28_s28, %s28_s28 }
   0x4   :  { %p2057_p0 = scmp.ne.s32.totalorder %s28_s28, %s2056_s29  ;;  %p2062_p2 = scmp.lt.s32.totalorder %s2056_s29, %s2056_s29 }
   0x6   :  { %p2063_p3 = por %p2062_p2, %p2061_p1 }
   0x8   :  { %p2064_p4 = pnand %p2063_p3, %p2057_p0 }
   0xa   :  { %2067 = shalt.err (!%p2064_p4)
}
   0xb   :  { %s2093_s30 = smov 512   ;;  %s2094_s9 = smov 32  }
   0xc   :  { %33 = dma.hbm_to_vmem [thread:$0]  %s2283_s3, 8192, %s28_s28, [#allocation3], %s2093_s30, %s2093_s30, %s2094_s9  }
   0xd   :  { %s2095_s12 = smov [#allocation4]  }
   0xe   :  { %s39_s13 = sshll.u32 %s2095_s12, 4  ;;  %s40_s13 = int_to_ptr.vmem [resolvable:$true] %s39_s13 }
   0xf   :  { %s2076_s14 = scalar_lea.vmem %s40_s13, 8192  ;;  %p2081_p6 = scmp.lt.s32.totalorder %s40_s13, %s40_s13 }
  0x10   :  { %p2077_p5 = scmp.ne.s32.totalorder %s40_s13, %s2076_s14  ;;  %p2082_p7 = scmp.lt.s32.totalorder %s2076_s14, %s2076_s14 }
  0x12   :  { %p2083_p8 = por %p2082_p7, %p2081_p6 }
  0x14   :  { %p2084_p9 = pnand %p2083_p8, %p2077_p5 }
  0x16   :  { %2087 = shalt.err (!%p2084_p9)
}
  0x17   :  { %s2096_s15 = smov 64   ;;  %s2097_s16 = smov 4  }
  0x18   :  { %45 = dma.hbm_to_vmem [thread:$0]  %s2284_s4, 8192, %s40_s13, [#allocation5], %s2096_s15, %s2096_s15, %s2097_s16  }
  0x19   :  { %2088 = dma.done.wait [#allocation3], 8192  }
  0x1a   :  { %2089 = vsyncadd [#allocation3], 4294959104 }
  0x1b   :  { %2090 = dma.done.wait [#allocation5], 8192  }
  0x1c   :  { %2091 = vsyncadd [#allocation5], 4294959104  ;;  %v2098_v0 = vmov 0.0   ;;  %vm2099_vm0 = vmmov 0   ;;  %v1952_v1 = vld [vmem:[%s2282_s2 + $0x8] sm:$0xff]   ;;  %v1953_v2 = vld [vmem:[%s2282_s2] sm:$0xff]  }
  0x1d   :  { %1914 = vmatprep.subr.bf16.mxu0 %v2098_v0  ;;  %1918 = vmatprep.mubr.msk.bf16.mxu0 %vm2099_vm0, %v2098_v0  ;;  %v61_v3 = vld [vmem:[%s2280_s0] sm:$0xf]  ;;  %v188_v7 = vld [vmem:[#allocation2 + $0x1c8] sm:$0xff]  ;;  %vm85_vm1 = vcmask 261120   ;;  %vm836_vm2 = vcmask 1041408   ;;  %vm845_vm3 = vcmask 1043456  }
  0x1e   :  { %1915 = vmatpush3.bf16.msra.mxu0 %v1952_v1  ;;  %v187_v4 = vld [vmem:[#allocation2 + $0x1c0] sm:$0xff]  ;;  %v192_v8 = vld [vmem:[#allocation2 + $0x1e8] sm:$0xff]  ;;  %v62_v15 = vpack.c.bf16 %v61_v3, %v61_v3 }
  0x1f   :  { %v191_v5 = vld [vmem:[#allocation2 + $0x1e0] sm:$0xff]  ;;  %1916 = vmatprep.subr.bf16.mxu0 %v2098_v0  ;;  %v1734_v11 = vcombine.high %v188_v7, %v192_v8  ;;  %v180_v13 = vld [vmem:[#allocation2 + $0x188] sm:$0xff]  ;;  %v1733_v19 = vcombine.low %v188_v7, %v192_v8  ;;  %v193_v7 = vld [vmem:[#allocation2 + $0x1f0] sm:$0xff] }
  0x20   :  { %v1732_v6 = vcombine.high %v187_v4, %v191_v5  ;;  %v1731_v9 = vcombine.low %v187_v4, %v191_v5  ;;  %v179_v10 = vld [vmem:[#allocation2 + $0x180] sm:$0xff]  ;;  %v184_v14 = vld [vmem:[#allocation2 + $0x1a8] sm:$0xff]  ;;  %v190_v8 = vld [vmem:[#allocation2 + $0x1d8] sm:$0xff] }
  0x21   :  { %v183_v12 = vld [vmem:[#allocation2 + $0x1a0] sm:$0xff]  ;;  %v1726_v21 = vcombine.high %v180_v13, %v184_v14  ;;  %v172_v23 = vld [vmem:[#allocation2 + $0x148] sm:$0xff]  ;;  %v1725_v27 = vcombine.low %v180_v13, %v184_v14  ;;  %v2100_v14 = vmov 0  }
  0x22   :  { %556 = vmatprep.subr.bf16.mxu1 %v1732_v6  ;;  %v1724_v16 = vcombine.high %v179_v10, %v183_v12  ;;  %v171_v17 = vld [vmem:[#allocation2 + $0x140] sm:$0xff]  ;;  %1917 = vmatpush3.bf16.msra.mxu0 %v1953_v2  ;;  %v1723_v20 = vcombine.low %v179_v10, %v183_v12  ;;  %v176_v24 = vld [vmem:[#allocation2 + $0x168] sm:$0xff]  ;;  %v189_v6 = vld [vmem:[#allocation2 + $0x1d0] sm:$0xff] }
  0x23   :  { %v175_v18 = vld [vmem:[#allocation2 + $0x160] sm:$0xff]  ;;  %557 = vmatpush1.bf16.msra.mxu1 %v1731_v9  ;;  %597 = vmatprep.subr.bf16.mxu0 %v1734_v11  ;;  %v164_v29 = vld [vmem:[#allocation2 + $0x108] sm:$0xff]  ;;  %v1718_v30 = vcombine.high %v172_v23, %v176_v24  ;;  %v1717_v35 = vcombine.low %v172_v23, %v176_v24  ;;  %v1736_v9 = vcombine.high %v189_v6, %v193_v7  ;;  %v194_v10 = vld [vmem:[#allocation2 + $0x1f8] sm:$0xff] }
  0x24   :  { %558 = vmatprep.subr.bf16.mxu1 %v1724_v16  ;;  %v1716_v22 = vcombine.high %v171_v17, %v175_v18  ;;  %v163_v25 = vld [vmem:[#allocation2 + $0x100] sm:$0xff]  ;;  %v1715_v28 = vcombine.low %v171_v17, %v175_v18  ;;  %v168_v32 = vld [vmem:[#allocation2 + $0x128] sm:$0xff]  ;;  %v1735_v11 = vcombine.low %v189_v6, %v193_v7  ;;  %v1737_v12 = vcombine.low %v190_v8, %v194_v10  ;;  %v181_v18 = vld [vmem:[#allocation2 + $0x190] sm:$0xff] }
  0x25   :  { %v167_v26 = vld [vmem:[#allocation2 + $0x120] sm:$0xff]  ;;  %1919 = vmatmul.mubr.msk.bf16.vlgmr.msra.gmra.mxu0 %vm85_vm1, %v62_v15  ;;  %v156_v37 = vld [vmem:[#allocation2 + $0xc8] sm:$0xff]  ;;  %v1710_v41 = vcombine.high %v164_v29, %v168_v32  ;;  %v1709_v43 = vcombine.low %v164_v29, %v168_v32  ;;  %v1738_v13 = vcombine.high %v190_v8, %v194_v10  ;;  %588 = vmatprep.mubr.bf16.mxu1 %v2100_v14  ;;  %v178_v32 = vld [vmem:[#allocation2 + $0x178] sm:$0xff] }
  0x26   :  { %598 = vmatpush1.bf16.msra.mxu0 %v1733_v19  ;;  %v1708_v31 = vcombine.high %v163_v25, %v167_v26  ;;  %v155_v33 = vld [vmem:[#allocation2 + $0xc0] sm:$0xff]  ;;  %v1707_v36 = vcombine.low %v163_v25, %v167_v26  ;;  %v160_v38 = vld [vmem:[#allocation2 + $0xe8] sm:$0xff]  ;;  %629 = vmatprep.mubr.bf16.mxu0 %v2100_v14  ;;  %v133_v6 = vld [vmem:[#allocation2 + $0x10] sm:$0xff] }
  0x27   :  { %559 = vmatpush1.bf16.msra.mxu1 %v1723_v20  ;;  %599 = vmatprep.subr.bf16.mxu0 %v1726_v21  ;;  %v159_v34 = vld [vmem:[#allocation2 + $0xe0] sm:$0xff]  ;;  %v148_v45 = vld [vmem:[#allocation2 + $0x88] sm:$0xff]  ;;  %v1702_v49 = vcombine.high %v156_v37, %v160_v38  ;;  %v1701_v51 = vcombine.low %v156_v37, %v160_v38  ;;  %v185_v20 = vld [vmem:[#allocation2 + $0x1b0] sm:$0xff] }
  0x28   :  { %560 = vmatprep.subr.bf16.mxu1 %v1716_v22  ;;  %v147_v39 = vld [vmem:[#allocation2 + $0x80] sm:$0xff]  ;;  %v1700_v42 = vcombine.high %v155_v33, %v159_v34  ;;  %v1699_v44 = vcombine.low %v155_v33, %v159_v34  ;;  %v152_v46 = vld [vmem:[#allocation2 + $0xa8] sm:$0xff]  ;;  %v182_v21 = vld [vmem:[#allocation2 + $0x198] sm:$0xff]  ;;  %v1728_v26 = vcombine.high %v181_v18, %v185_v20  ;;  %v1727_v33 = vcombine.low %v181_v18, %v185_v20 }
  0x29   :  { %v151_v40 = vld [vmem:[#allocation2 + $0xa0] sm:$0xff]  ;;  %v140_v53 = vld [vmem:[#allocation2 + $0x48] sm:$0xff]  ;;  %v1694_v55 = vcombine.high %v148_v45, %v152_v46  ;;  %v1693_v57 = vcombine.low %v148_v45, %v152_v46  ;;  %v186_v22 = vld [vmem:[#allocation2 + $0x1b8] sm:$0xff] }
  0x2a   :  { %600 = vmatpush1.bf16.msra.mxu0 %v1725_v27  ;;  %v139_v47 = vld [vmem:[#allocation2 + $0x40] sm:$0xff]  ;;  %v1692_v50 = vcombine.high %v147_v39, %v151_v40  ;;  %v1691_v52 = vcombine.low %v147_v39, %v151_v40  ;;  %v144_v54 = vld [vmem:[#allocation2 + $0x68] sm:$0xff]  ;;  %v1730_v27 = vcombine.high %v182_v21, %v186_v22  ;;  %v1729_v34 = vcombine.low %v182_v21, %v186_v22  ;;  %v165_v37 = vld [vmem:[#allocation2 + $0x110] sm:$0xff] }
  0x2b   :  { %561 = vmatpush1.bf16.msra.mxu1 %v1715_v28  ;;  %601 = vmatprep.subr.bf16.mxu0 %v1718_v30  ;;  %v143_v48 = vld [vmem:[#allocation2 + $0x60] sm:$0xff]  ;;  %v1686_v59 = vcombine.high %v140_v53, %v144_v54  ;;  %v1685_v60 = vcombine.low %v140_v53, %v144_v54  ;;  %v132_v63 = vld [vmem:[#allocation2 + $0x8] sm:$0xff]  ;;  %v173_v28 = vld [vmem:[#allocation2 + $0x150] sm:$0xff] }
  0x2c   :  { %562 = vmatprep.subr.bf16.mxu1 %v1708_v31  ;;  %v1684_v56 = vcombine.high %v139_v47, %v143_v48  ;;  %v1683_v58 = vcombine.low %v139_v47, %v143_v48  ;;  %v131_v61 = vld [vmem:[#allocation2] sm:$0xff]  ;;  %v136_v2 = vld [vmem:[#allocation2 + $0x28] sm:$0xff]  ;;  %v177_v30 = vld [vmem:[#allocation2 + $0x170] sm:$0xff] }
  0x2d   :  { %v135_v62 = vld [vmem:[#allocation2 + $0x20] sm:$0xff]  ;;  %v1677_v3 = vcombine.low %v132_v63, %v136_v2  ;;  %v1678_v4 = vcombine.high %v132_v63, %v136_v2  ;;  %v174_v31 = vld [vmem:[#allocation2 + $0x158] sm:$0xff]  ;;  %v169_v38 = vld [vmem:[#allocation2 + $0x130] sm:$0xff] }
  0x2e   :  { %602 = vmatpush1.bf16.msra.mxu0 %v1717_v35  ;;  %v1676_v1 = vcombine.high %v131_v61, %v135_v62  ;;  %v1675_v5 = vcombine.low %v131_v61, %v135_v62  ;;  %v1671_v15 = vld [vmem:[%s2286_s6] ss:$0 sm:$0xff]  ;;  %v1720_v35 = vcombine.high %v173_v28, %v177_v30  ;;  %v166_v39 = vld [vmem:[#allocation2 + $0x118] sm:$0xff]  ;;  %v157_v45 = vld [vmem:[#allocation2 + $0xd0] sm:$0xff] }
  0x2f   :  { %563 = vmatpush1.bf16.msra.mxu1 %v1707_v36  ;;  %603 = vmatprep.subr.bf16.mxu0 %v1710_v41  ;;  %v1722_v36 = vcombine.high %v174_v31, %v178_v32  ;;  %v170_v40 = vld [vmem:[#allocation2 + $0x138] sm:$0xff]  ;;  %v1719_v41 = vcombine.low %v173_v28, %v177_v30  ;;  %v161_v46 = vld [vmem:[#allocation2 + $0xf0] sm:$0xff]  ;;  %v1965_v28 = vld [vmem:[#allocation4 + $0xa8] sm:$0xff]  }
  0x30   :  { %564 = vmatprep.subr.bf16.mxu1 %v1700_v42  ;;  %v1721_v42 = vcombine.low %v174_v31, %v178_v32  ;;  %v158_v47 = vld [vmem:[#allocation2 + $0xd8] sm:$0xff]  ;;  %v149_v53 = vld [vmem:[#allocation2 + $0x90] sm:$0xff]  ;;  %v1967_v30 = vld [vmem:[#allocation4 + $0xe0] sm:$0xff]  }
  0x31   :  { %v162_v48 = vld [vmem:[#allocation2 + $0xf8] sm:$0xff]  ;;  %v153_v54 = vld [vmem:[#allocation2 + $0xb0] sm:$0xff]  ;;  %v1968_v31 = vld [vmem:[#allocation4 + $0x20] sm:$0xff]  }
  0x32   :  { %604 = vmatpush1.bf16.msra.mxu0 %v1709_v43  ;;  %v1712_v43 = vcombine.high %v165_v37, %v169_v38  ;;  %v141_v61 = vld [vmem:[#allocation2 + $0x50] sm:$0xff]  ;;  %v142_v63 = vld [vmem:[#allocation2 + $0x58] sm:$0xff]  ;;  %v1695_v2 = vcombine.low %v149_v53, %v153_v54 }
  0x33   :  { %565 = vmatpush1.bf16.msra.mxu1 %v1699_v44  ;;  %605 = vmatprep.subr.bf16.mxu0 %v1702_v49  ;;  %v1714_v44 = vcombine.high %v166_v39, %v170_v40  ;;  %v1711_v49 = vcombine.low %v165_v37, %v169_v38  ;;  %v145_v62 = vld [vmem:[#allocation2 + $0x70] sm:$0xff]  ;;  %v134_v8 = vld [vmem:[#allocation2 + $0x18] sm:$0xff] }
  0x34   :  { %566 = vmatprep.subr.bf16.mxu1 %v1692_v50  ;;  %v1713_v50 = vcombine.low %v166_v39, %v170_v40  ;;  %v137_v7 = vld [vmem:[#allocation2 + $0x30] sm:$0xff]  ;;  %v1687_v10 = vcombine.low %v141_v61, %v145_v62  ;;  %v1956_v18 = vld [vmem:[#allocation4 + $0x38] sm:$0xff]   ;;  %v1978_v40 = vld [vmem:[#allocation4 + $0x48] sm:$0xff]  }
  0x35   :  { %v1958_v20 = vld [vmem:[#allocation4 + $0x70] sm:$0xff]   ;;  %v1970_v32 = vld [vmem:[#allocation4 + $0x58] sm:$0xff]  }
  0x36   :  { %606 = vmatpush1.bf16.msra.mxu0 %v1701_v51  ;;  %v1704_v51 = vcombine.high %v157_v45, %v161_v46  ;;  %v1959_v21 = vld [vmem:[#allocation4 + $0xf0] sm:$0xff]  }
  0x37   :  { %567 = vmatpush1.bf16.msra.mxu1 %v1691_v52  ;;  %607 = vmatprep.subr.bf16.mxu0 %v1694_v55  ;;  %v1706_v52 = vcombine.high %v158_v47, %v162_v48  ;;  %v150_v55 = vld [vmem:[#allocation2 + $0x98] sm:$0xff]  ;;  %v1960_v22 = vld [vmem:[#allocation4 + $0x30] sm:$0xff]  }
  0x38   :  { %568 = vmatprep.subr.bf16.mxu1 %v1684_v56  ;;  %v154_v56 = vld [vmem:[#allocation2 + $0xb8] sm:$0xff]  ;;  %v1975_v37 = vld [vmem:[#allocation4 + $0xd0] sm:$0xff]  }
  0x39   :  { %v1976_v38 = vld [vmem:[#allocation4 + $0x10] sm:$0xff]  }
  0x3a   :  { %608 = vmatpush1.bf16.msra.mxu0 %v1693_v57  ;;  %v1703_v57 = vcombine.low %v157_v45, %v161_v46  ;;  %v1977_v39 = vld [vmem:[#allocation4 + $0x90] sm:$0xff]   ;;  %v1983_v45 = vld [vmem:[#allocation4 + $0xc0] sm:$0xff]  }
  0x3b   :  { %569 = vmatpush1.bf16.msra.mxu1 %v1683_v58  ;;  %609 = vmatprep.subr.bf16.mxu0 %v1686_v59  ;;  %v1705_v58 = vcombine.low %v158_v47, %v162_v48  ;;  %v1696_v59 = vcombine.high %v149_v53, %v153_v54  ;;  %v1984_v46 = vld [vmem:[#allocation4] sm:$0xff]   ;;  %v1987_v48 = vld [vmem:[#allocation4 + $0x178] sm:$0xff]  }
  0x3c   :  { %570 = vmatprep.subr.bf16.mxu1 %v1676_v1  ;;  %v146_v1 = vld [vmem:[#allocation2 + $0x78] sm:$0xff]  ;;  %v1985_v47 = vld [vmem:[#allocation4 + $0x80] sm:$0xff]  }
  0x3d   :  { %v2182_v54 = vld [vmem:[%s2286_s6 + $0x1] sm:$0xff] }
  0x3e   :  { %610 = vmatpush1.bf16.msra.mxu0 %v1685_v60  ;;  %v1698_v60 = vcombine.high %v150_v55, %v154_v56 }
  0x3f   :  { %611 = vmatprep.subr.bf16.mxu0 %v1678_v4  ;;  %571 = vmatpush1.bf16.msra.mxu1 %v1675_v5  ;;  %v1688_v4 = vcombine.high %v141_v61, %v145_v62  ;;  %v1690_v5 = vcombine.high %v142_v63, %v146_v1 }
  0x40   :  { %638 = vmatprep.subr.bf16.mxu1 %v1736_v9  ;;  %v138_v9 = vld [vmem:[#allocation2 + $0x38] sm:$0xff] }
  0x42   :  { %612 = vmatpush1.bf16.msra.mxu0 %v1677_v3  ;;  %v1697_v3 = vcombine.low %v150_v55, %v154_v56 }
  0x43   :  { %679 = vmatprep.subr.bf16.mxu0 %v1738_v13  ;;  %v1682_v13 = vcombine.high %v134_v8, %v138_v9 }
  0xe5   :  { %v123_v16 = vpop.f32.mrf.mxu0 }
  0xe6   :  { %v124_v17 = vadd.f32 %v1671_v15, %v123_v16  ;;  %v1681_v15 = vcombine.low %v134_v8, %v138_v9  ;;  %v1954_v16 = vld [vmem:[#allocation4 + $0x78] sm:$0xff]  }
  0xe7   :  { %v1920_v19 = vpop.f32.mrf.mxu0 }
  0xe8   :  { %v129_v23 = vmax.f32 %v124_v17, 0.0  ;;  %v1955_v17 = vld [vmem:[#allocation4 + $0xf8] sm:$0xff]  }
  0xe9   :  { %v126_v24 = vpop.f32.mrf.mxu0  ;;  %v1957_v19 = vld [vmem:[#allocation4 + $0xb8] sm:$0xff]  }
  0xea   :  { %v2169_v25 = vpack.c.bf16 %v129_v23, %v129_v23  ;;  %v1961_v23 = vld [vmem:[#allocation4 + $0xb0] sm:$0xff]   ;;  %v1962_v24 = vld [vmem:[#allocation4 + $0x68] sm:$0xff]  }
  0xeb   :  { %v1921_v29 = vpop.f32.mrf.mxu0 }
  0xec   :  { %589 = vmatmul.mubr.bf16.vlgmr.msra.gmra.mxu1 %v2169_v25  ;;  %630 = vmatmul.mubr.bf16.vlgmr.msra.gmra.mxu0 %v2169_v25  ;;  %v1966_v29 = vld [vmem:[#allocation4 + $0x60] sm:$0xff]  }
  0xed   :  { %639 = vmatpush1.bf16.msra.mxu1 %v1735_v11  ;;  %680 = vmatpush1.bf16.msra.mxu0 %v1737_v12  ;;  %v1689_v11 = vcombine.low %v142_v63, %v146_v1  ;;  %v1680_v12 = vcombine.high %v133_v6, %v137_v7 }
  0xee   :  { %640 = vmatprep.subr.bf16.mxu1 %v1728_v26  ;;  %681 = vmatprep.subr.bf16.mxu0 %v1730_v27  ;;  %v1963_v26 = vld [vmem:[#allocation4 + $0xe8] sm:$0xff]  }
  0xef   :  { %670 = vmatprep.mubr.bf16.mxu1 %v2100_v14  ;;  %711 = vmatprep.mubr.bf16.mxu0 %v2100_v14  ;;  %v1679_v14 = vcombine.low %v133_v6, %v137_v7  ;;  %v1964_v27 = vld [vmem:[#allocation4 + $0x28] sm:$0xff]  }
  0xf1   :  { %641 = vmatpush1.bf16.msra.mxu1 %v1727_v33  ;;  %682 = vmatpush1.bf16.msra.mxu0 %v1729_v34  ;;  %v1971_v33 = vld [vmem:[#allocation4 + $0xd8] sm:$0xff]  }
  0xf2   :  { %642 = vmatprep.subr.bf16.mxu1 %v1720_v35  ;;  %683 = vmatprep.subr.bf16.mxu0 %v1722_v36  ;;  %v1972_v34 = vld [vmem:[#allocation4 + $0x18] sm:$0xff]   ;;  %v1974_v36 = vld [vmem:[#allocation4 + $0x50] sm:$0xff]  }
  0xf3   :  { %v1973_v35 = vld [vmem:[#allocation4 + $0x98] sm:$0xff]  }
  0xf5   :  { %643 = vmatpush1.bf16.msra.mxu1 %v1719_v41  ;;  %684 = vmatpush1.bf16.msra.mxu0 %v1721_v42  ;;  %v1979_v41 = vld [vmem:[#allocation4 + $0xc8] sm:$0xff]  }
  0xf6   :  { %644 = vmatprep.subr.bf16.mxu1 %v1712_v43  ;;  %685 = vmatprep.subr.bf16.mxu0 %v1714_v44  ;;  %v1980_v42 = vld [vmem:[#allocation4 + $0x8] sm:$0xff]   ;;  %v1982_v44 = vld [vmem:[#allocation4 + $0x40] sm:$0xff]  }
  0xf7   :  { %v1981_v43 = vld [vmem:[#allocation4 + $0x88] sm:$0xff]  }
  0xf9   :  { %645 = vmatpush1.bf16.msra.mxu1 %v1711_v49  ;;  %686 = vmatpush1.bf16.msra.mxu0 %v1713_v50  ;;  %v1988_v49 = vld [vmem:[#allocation4 + $0x1f8] sm:$0xff]   ;;  %v196_v50 = vlaneseq }
  0xfa   :  { %646 = vmatprep.subr.bf16.mxu1 %v1704_v51  ;;  %687 = vmatprep.subr.bf16.mxu0 %v1706_v52 }
  0xfb   :  { %v2175_v51 = vshrl.u32 %v196_v50, 7 }
  0xfd   :  { %647 = vmatpush1.bf16.msra.mxu1 %v1703_v57  ;;  %688 = vmatpush1.bf16.msra.mxu0 %v1705_v58  ;;  %v198_v52 = vsub.s32 0, %v2175_v51  ;;  %v206_v53 = vsub.s32 2, %v2175_v51  ;;  %v202_v55 = vsub.s32 1, %v2175_v51  ;;  %v210_v56 = vsub.s32 3, %v2175_v51 }
  0xfe   :  { %648 = vmatprep.subr.bf16.mxu1 %v1696_v59  ;;  %689 = vmatprep.subr.bf16.mxu0 %v1698_v60  ;;  %v2101_v60 = vmov 1983009808   ;;  %v222_v50 = vsub.s32 6, %v2175_v51 }
  0xff   :  { %v199_v57 = vrot.slane %v2182_v54, %v198_v52  ;;  %v207_v58 = vrot.slane %v2182_v54, %v206_v53  ;;  %v203_v59 = vrot.slane %v2182_v54, %v202_v55  ;;  %v739_v61 = vunpack.c.l.s4 %v2101_v60  ;;  %v1993_v52 = vld [vmem:[#allocation4 + $0x130] sm:$0xff]   ;;  %v1995_v55 = vld [vmem:[#allocation4 + $0x168] sm:$0xff]  }
 0x100   :  { %v211_v62 = vrot.slane %v2182_v54, %v210_v56  ;;  %v1994_v53 = vld [vmem:[#allocation4 + $0x1b0] sm:$0xff]   ;;  %v218_v56 = vsub.s32 5, %v2175_v51  ;;  %v223_v60 = vrot.slane %v2182_v54, %v222_v50 }
 0x101   :  { %649 = vmatpush1.bf16.msra.mxu1 %v1695_v2  ;;  %690 = vmatpush1.bf16.msra.mxu0 %v1697_v3  ;;  %v740_v7 = vunpack.c.0.s8 %v739_v61  ;;  %v1997_v61 = vld [vmem:[#allocation4 + $0x128] sm:$0xff]  }
 0x102   :  { %650 = vmatprep.subr.bf16.mxu1 %v1688_v4  ;;  %691 = vmatprep.subr.bf16.mxu0 %v1690_v5 }
 0x105   :  { %651 = vmatpush1.bf16.msra.mxu1 %v1687_v10  ;;  %692 = vmatpush1.bf16.msra.mxu0 %v1689_v11  ;;  %v774_v11 = vld [vmem:[%s2281_s1] sm:$0xff] }
 0x106   :  { %652 = vmatprep.subr.bf16.mxu1 %v1680_v12  ;;  %693 = vmatprep.subr.bf16.mxu0 %v1682_v13 }
 0x109   :  { %653 = vmatpush1.bf16.msra.mxu1 %v1679_v14  ;;  %694 = vmatpush1.bf16.msra.mxu0 %v1681_v15  ;;  %v2194_v14 = vsub.s32 %v740_v7, %v2175_v51  ;;  %v778_v15 = vcombine.low %v774_v11, %v774_v11 }
 0x10a   :  { %1817 = vmatprep.subr.bf16.mxu1 %v1954_v16  ;;  %1839 = vmatprep.subr.bf16.mxu0 %v1955_v17 }
 0x10b   :  { %v785_v16 = vrot.slane %v778_v15, %v2194_v14  ;;  %v792_v17 = vrot.slane %v774_v11, %v2194_v14 }
 0x10c   :  { %671 = vmatmul.mubr.bf16.vlgmr.msra.gmra.mxu1 %v2169_v25  ;;  %712 = vmatmul.mubr.bf16.vlgmr.msra.gmra.mxu0 %v2169_v25  ;;  %v1969_v25 = vld [vmem:[#allocation4 + $0xa0] sm:$0xff]  }
 0x10d   :  { %1818 = vmatpush3.bf16.msra.mxu1 %v1956_v18  ;;  %1840 = vmatpush3.bf16.msra.mxu0 %v1957_v19  ;;  %v793_v18 = vcombine.high %v785_v16, %v785_v16 }
 0x10e   :  { %1819 = vmatprep.subr.bf16.mxu1 %v1958_v20  ;;  %1841 = vmatprep.subr.bf16.mxu0 %v1959_v21  ;;  %v794_v20 = vcombine.high %v792_v17, %v792_v17 }
 0x111   :  { %1820 = vmatpush3.bf16.msra.mxu1 %v1960_v22  ;;  %1842 = vmatpush3.bf16.msra.mxu0 %v1961_v23 }
 0x112   :  { %1821 = vmatprep.subr.bf16.mxu1 %v1962_v24  ;;  %1843 = vmatprep.subr.bf16.mxu0 %v1963_v26 }
 0x115   :  { %1822 = vmatpush3.bf16.msra.mxu1 %v1964_v27  ;;  %1844 = vmatpush3.bf16.msra.mxu0 %v1965_v28 }
 0x116   :  { %1823 = vmatprep.subr.bf16.mxu1 %v1966_v29  ;;  %1845 = vmatprep.subr.bf16.mxu0 %v1967_v30 }
 0x119   :  { %1824 = vmatpush3.bf16.msra.mxu1 %v1968_v31  ;;  %1846 = vmatpush3.bf16.msra.mxu0 %v1969_v25 }
 0x11a   :  { %1825 = vmatprep.subr.bf16.mxu1 %v1970_v32  ;;  %1847 = vmatprep.subr.bf16.mxu0 %v1971_v33 }
 0x11d   :  { %1826 = vmatpush3.bf16.msra.mxu1 %v1972_v34  ;;  %1848 = vmatpush3.bf16.msra.mxu0 %v1973_v35 }
 0x11e   :  { %1827 = vmatprep.subr.bf16.mxu1 %v1974_v36  ;;  %1849 = vmatprep.subr.bf16.mxu0 %v1975_v37 }
 0x121   :  { %1828 = vmatpush3.bf16.msra.mxu1 %v1976_v38  ;;  %1850 = vmatpush3.bf16.msra.mxu0 %v1977_v39 }
 0x122   :  { %1829 = vmatprep.subr.bf16.mxu1 %v1978_v40  ;;  %1851 = vmatprep.subr.bf16.mxu0 %v1979_v41  ;;  %v1989_v41 = vld [vmem:[#allocation4 + $0x138] sm:$0xff]  }
 0x125   :  { %1830 = vmatpush3.bf16.msra.mxu1 %v1980_v42  ;;  %1852 = vmatpush3.bf16.msra.mxu0 %v1981_v43 }
 0x126   :  { %1831 = vmatprep.subr.bf16.mxu1 %v1982_v44  ;;  %1853 = vmatprep.subr.bf16.mxu0 %v1983_v45  ;;  %v1990_v44 = vld [vmem:[#allocation4 + $0x1b8] sm:$0xff]   ;;  %v1991_v45 = vld [vmem:[#allocation4 + $0x170] sm:$0xff]  }
 0x129   :  { %1832 = vmatpush3.bf16.msra.mxu1 %v1984_v46  ;;  %1854 = vmatpush3.bf16.msra.mxu0 %v1985_v47 }
 0x12a   :  { %1861 = vmatprep.subr.bf16.mxu1 %v1987_v48  ;;  %1883 = vmatprep.subr.bf16.mxu0 %v1988_v49  ;;  %v1992_v48 = vld [vmem:[#allocation4 + $0x1f0] sm:$0xff]   ;;  %v214_v49 = vsub.s32 4, %v2175_v51 }
 0x1ac   :  { %v590_v63 = vpop.f32.mrf.mxu1  ;;  %v631_v1 = vpop.f32.mrf.mxu0 }
 0x1ad   :  { %v591_v2 = vadd.f32 %v590_v63, %v199_v57  ;;  %v632_v3 = vadd.f32 %v631_v1, %v207_v58  ;;  %v226_v57 = vsub.s32 7, %v2175_v51  ;;  %v1996_v58 = vld [vmem:[#allocation4 + $0x1e8] sm:$0xff]   ;;  %v2000_v51 = vld [vmem:[#allocation4 + $0x1e0] sm:$0xff]  }
 0x1ae   :  { %v592_v4 = vpop.f32.mrf.mxu1  ;;  %v633_v5 = vpop.f32.mrf.mxu0  ;;  %v1998_v1 = vld [vmem:[#allocation4 + $0x1a8] sm:$0xff]  }
 0x1af   :  { %2028 = vtanh.f32 %v591_v2  ;;  %v593_v6 = vadd.f32 %v592_v4, %v203_v59  ;;  %v634_v8 = vadd.f32 %v633_v5, %v211_v62  ;;  %v215_v59 = vrot.slane %v2182_v54, %v214_v49  ;;  %v1999_v2 = vld [vmem:[#allocation4 + $0x160] sm:$0xff]  }
 0x1b0   :  { %2030 = vtanh.f32 %v632_v3  ;;  %v594_v9 = vpop.f32.mrf.mxu1  ;;  %v635_v10 = vpop.f32.mrf.mxu0  ;;  %v219_v62 = vrot.slane %v2182_v54, %v218_v56  ;;  %v227_v63 = vrot.slane %v2182_v54, %v226_v57 }
 0x1b1   :  { %2032 = vtanh.f32 %v593_v6  ;;  %v2001_v9 = vld [vmem:[#allocation4 + $0x120] sm:$0xff]  }
 0x1b2   :  { %2034 = vtanh.f32 %v634_v8  ;;  %v595_v12 = vpop.f32.mrf.mxu1  ;;  %v636_v13 = vpop.f32.mrf.mxu0 }
 0x1b3   :  { %v2002_v12 = vld [vmem:[#allocation4 + $0x1a0] sm:$0xff]   ;;  %v2003_v13 = vld [vmem:[#allocation4 + $0x158] sm:$0xff]  }
 0x1bc   :  { %v2029_v19 = vpop.eup %2028 }
 0x1bd   :  { %v2031_v21 = vpop.eup %2030  ;;  %v820_v22 = vrot.slane %v2029_v19, 6  ;;  %v837_v23 = vsel %vm836_vm2, %v2029_v19, %v785_v16  ;;  %v2004_v16 = vld [vmem:[#allocation4 + $0x1d8] sm:$0xff]  }
 0x1be   :  { %v2033_v24 = vpop.eup %2032  ;;  %v822_v26 = vrot.slane %v2031_v21, 6  ;;  %v839_v27 = vsel %vm836_vm2, %v2031_v21, %v792_v17  ;;  %v775_v17 = vld [vmem:[%s2281_s1 + $0x8] sm:$0xff] }
 0x1bf   :  { %v2035_v28 = vpop.eup %2034  ;;  %v736_v29 = vcombine.low %v2029_v19, %v2033_v24  ;;  %v821_v30 = vrot.slane %v2033_v24, 6  ;;  %v838_v31 = vsel %vm836_vm2, %v2033_v24, %v793_v18  ;;  %v846_v34 = vsel %vm845_vm3, %v837_v23, %v820_v22  ;;  %v2007_v22 = vld [vmem:[#allocation4 + $0x150] sm:$0xff]  }
 0x1c0   :  { %v737_v25 = vcombine.low %v2031_v21, %v2035_v28  ;;  %v823_v32 = vrot.slane %v2035_v28, 6  ;;  %v840_v33 = vsel %vm836_vm2, %v2035_v28, %v794_v20  ;;  %v848_v37 = vsel %vm845_vm3, %v839_v27, %v822_v26  ;;  %v2005_v20 = vld [vmem:[#allocation4 + $0x118] sm:$0xff]   ;;  %v2008_v24 = vld [vmem:[#allocation4 + $0x1d0] sm:$0xff]   ;;  %v2011_v28 = vld [vmem:[#allocation4 + $0x148] sm:$0xff]  }
 0x1c1   :  { %v744_v35 = vrot.slane %v736_v29, %v2194_v14  ;;  %v847_v36 = vsel %vm845_vm3, %v838_v31, %v821_v30  ;;  %v854_v43 = vpack.c.bf16 %v846_v34, %v846_v34  ;;  %v856_v47 = vpack.c.bf16 %v848_v37, %v848_v37  ;;  %v2006_v21 = vld [vmem:[#allocation4 + $0x198] sm:$0xff]   ;;  %v2009_v26 = vld [vmem:[#allocation4 + $0x110] sm:$0xff]   ;;  %v2012_v30 = vld [vmem:[#allocation4 + $0x1c8] sm:$0xff]  }
 0x1c2   :  { %v751_v38 = vrot.slane %v737_v25, %v2194_v14  ;;  %v855_v39 = vpack.c.bf16 %v847_v36, %v847_v36  ;;  %v849_v40 = vsel %vm845_vm3, %v840_v33, %v823_v32  ;;  %v795_v23 = vcombine.low %v775_v17, %v775_v17  ;;  %v2010_v27 = vld [vmem:[#allocation4 + $0x190] sm:$0xff]   ;;  %v2013_v25 = vld [vmem:[#allocation4 + $0x108] sm:$0xff]   ;;  %v2015_v33 = vld [vmem:[#allocation4 + $0x140] sm:$0xff]  }
 0x1c3   :  { %v857_v42 = vpack.c.bf16 %v849_v40, %v849_v40  ;;  %v809_v31 = vrot.slane %v775_v17, %v2194_v14  ;;  %v2014_v32 = vld [vmem:[#allocation4 + $0x188] sm:$0xff]   ;;  %v2016_v36 = vld [vmem:[#allocation4 + $0x1c0] sm:$0xff]  }
 0x1c4   :  { %v752_v46 = vcombine.low %v744_v35, %v751_v38  ;;  %1412 = vmatprep.mubr.bf16.mxu1 %v855_v39  ;;  %v802_v29 = vrot.slane %v795_v23, %v2194_v14 }
 0x1c5   :  { %1452 = vmatprep.mubr.bf16.mxu0 %v857_v42  ;;  %1413 = vmatmul.mubr.bf16.vlgmr.msra.gmra.mxu1 %v854_v43  ;;  %v811_v37 = vcombine.high %v809_v31, %v809_v31  ;;  %v2017_v42 = vld [vmem:[#allocation4 + $0x100] sm:$0xff]  }
 0x1c6   :  { %772 = vst [vmem:[%s2287_s7] sm:$0xff] %v752_v46  ;;  %1453 = vmatmul.mubr.bf16.vlgmr.msra.gmra.mxu0 %v856_v47  ;;  %1862 = vmatpush3.bf16.msra.mxu1 %v1989_v41  ;;  %v810_v34 = vcombine.high %v802_v29, %v802_v29  ;;  %v2018_v47 = vld [vmem:[#allocation4 + $0x180] sm:$0xff]  }
 0x1c7   :  { %1884 = vmatpush3.bf16.msra.mxu0 %v1990_v44  ;;  %1863 = vmatprep.subr.bf16.mxu1 %v1991_v45 }
 0x1c8   :  { %1885 = vmatprep.subr.bf16.mxu0 %v1992_v48 }
 0x1ca   :  { %1864 = vmatpush3.bf16.msra.mxu1 %v1993_v52 }
 0x1cb   :  { %1886 = vmatpush3.bf16.msra.mxu0 %v1994_v53  ;;  %1865 = vmatprep.subr.bf16.mxu1 %v1995_v55 }
 0x1cc   :  { %v672_v3 = vpop.f32.mrf.mxu1  ;;  %v713_v4 = vpop.f32.mrf.mxu0  ;;  %1887 = vmatprep.subr.bf16.mxu0 %v1996_v58 }
 0x1cd   :  { %v673_v5 = vadd.f32 %v672_v3, %v215_v59  ;;  %v714_v6 = vadd.f32 %v713_v4, %v223_v60  ;;  %v2021_v3 = vld [vmem:[%s2285_s5 + $0x30] sm:$0xff]   ;;  %v2022_v4 = vld [vmem:[%s2285_s5 + $0x28] sm:$0xff]  }
 0x1ce   :  { %v674_v7 = vpop.f32.mrf.mxu1  ;;  %v715_v8 = vpop.f32.mrf.mxu0  ;;  %1866 = vmatpush3.bf16.msra.mxu1 %v1997_v61 }
 0x1cf   :  { %2036 = vtanh.f32 %v673_v5  ;;  %v675_v10 = vadd.f32 %v674_v7, %v219_v62  ;;  %v716_v11 = vadd.f32 %v715_v8, %v227_v63  ;;  %1888 = vmatpush3.bf16.msra.mxu0 %v1998_v1  ;;  %1867 = vmatprep.subr.bf16.mxu1 %v1999_v2  ;;  %v2024_v5 = vld [vmem:[%s2285_s5 + $0x18] sm:$0xff]   ;;  %v2026_v7 = vld [vmem:[%s2285_s5 + $0x8] sm:$0xff]   ;;  %v2027_v8 = vld [vmem:[%s2285_s5] sm:$0xff]  }
 0x1d0   :  { %2038 = vtanh.f32 %v714_v6  ;;  %v676_v54 = vpop.f32.mrf.mxu1  ;;  %v717_v15 = vpop.f32.mrf.mxu0  ;;  %1889 = vmatprep.subr.bf16.mxu0 %v2000_v51  ;;  %v2023_v51 = vld [vmem:[%s2285_s5 + $0x20] sm:$0xff]   ;;  %v2025_v6 = vld [vmem:[%s2285_s5 + $0x10] sm:$0xff]  }
 0x1d1   :  { %2040 = vtanh.f32 %v675_v10 }
 0x1d2   :  { %2042 = vtanh.f32 %v716_v11  ;;  %v677_v18 = vpop.f32.mrf.mxu1  ;;  %v718_v19 = vpop.f32.mrf.mxu0  ;;  %1868 = vmatpush3.bf16.msra.mxu1 %v2001_v9 }
 0x1d3   :  { %1890 = vmatpush3.bf16.msra.mxu0 %v2002_v12  ;;  %1869 = vmatprep.subr.bf16.mxu1 %v2003_v13  ;;  %v1739_v18 = vld [vmem:[%s2286_s6 + $0x9] ss:$0 sm:$0xff] }
 0x1d4   :  { %1891 = vmatprep.subr.bf16.mxu0 %v2004_v16 }
 0x1d6   :  { %1870 = vmatpush3.bf16.msra.mxu1 %v2005_v20 }
 0x1d7   :  { %1892 = vmatpush3.bf16.msra.mxu0 %v2006_v21  ;;  %1871 = vmatprep.subr.bf16.mxu1 %v2007_v22 }
 0x1d8   :  { %1893 = vmatprep.subr.bf16.mxu0 %v2008_v24 }
 0x1da   :  { %1872 = vmatpush3.bf16.msra.mxu1 %v2009_v26 }
 0x1db   :  { %1894 = vmatpush3.bf16.msra.mxu0 %v2010_v27  ;;  %1873 = vmatprep.subr.bf16.mxu1 %v2011_v28 }
 0x1dc   :  { %v2037_v35 = vpop.eup %2036  ;;  %1895 = vmatprep.subr.bf16.mxu0 %v2012_v30 }
 0x1dd   :  { %v2039_v38 = vpop.eup %2038  ;;  %v824_v39 = vrot.slane %v2037_v35, 6  ;;  %v841_v40 = vsel %vm836_vm2, %v2037_v35, %v802_v29 }
 0x1de   :  { %v2041_v41 = vpop.eup %2040  ;;  %1874 = vmatpush3.bf16.msra.mxu1 %v2013_v25  ;;  %v826_v43 = vrot.slane %v2039_v38, 6  ;;  %v843_v44 = vsel %vm836_vm2, %v2039_v38, %v809_v31 }
 0x1df   :  { %v2043_v45 = vpop.eup %2042  ;;  %v753_v46 = vcombine.low %v2037_v35, %v2041_v41  ;;  %1896 = vmatpush3.bf16.msra.mxu0 %v2014_v32  ;;  %1875 = vmatprep.subr.bf16.mxu1 %v2015_v33  ;;  %v825_v48 = vrot.slane %v2041_v41, 6  ;;  %v842_v49 = vsel %vm836_vm2, %v2041_v41, %v810_v34  ;;  %v850_v55 = vsel %vm845_vm3, %v841_v40, %v824_v39 }
 0x1e0   :  { %v754_v50 = vcombine.low %v2039_v38, %v2043_v45  ;;  %1897 = vmatprep.subr.bf16.mxu0 %v2016_v36  ;;  %v827_v52 = vrot.slane %v2043_v45, 6  ;;  %v844_v53 = vsel %vm836_vm2, %v2043_v45, %v811_v37  ;;  %v852_v58 = vsel %vm845_vm3, %v843_v44, %v826_v43  ;;  %v1804_v36 = vld [vmem:[%s2286_s6 + $0xa] ss:$0 sm:$0xff] }
 0x1e1   :  { %v761_v56 = vrot.slane %v753_v46, %v2194_v14  ;;  %v851_v57 = vsel %vm845_vm3, %v842_v49, %v825_v48  ;;  %v858_v63 = vpack.c.bf16 %v850_v55, %v850_v55  ;;  %v860_v2 = vpack.c.bf16 %v852_v58, %v852_v58 }
 0x1e2   :  { %v768_v59 = vrot.slane %v754_v50, %v2194_v14  ;;  %1876 = vmatpush3.bf16.msra.mxu1 %v2017_v42  ;;  %v859_v60 = vpack.c.bf16 %v851_v57, %v851_v57  ;;  %v853_v61 = vsel %vm845_vm3, %v844_v53, %v827_v52  ;;  %v2020_v14 = vld [vmem:[%s2285_s5 + $0x38] sm:$0xff]  }
 0x1e3   :  { %1898 = vmatpush3.bf16.msra.mxu0 %v2018_v47  ;;  %v861_v62 = vpack.c.bf16 %v853_v61, %v853_v61  ;;  %1922 = vmatprep.subr.bf16.mxu1 %v2098_v0 }
 0x1e4   :  { %v769_v1 = vcombine.low %v761_v56, %v768_v59  ;;  %1492 = vmatprep.mubr.bf16.mxu1 %v859_v60 }
 0x1e5   :  { %1532 = vmatprep.mubr.bf16.mxu0 %v861_v62  ;;  %1493 = vmatmul.mubr.bf16.vlgmr.msra.gmra.mxu1 %v858_v63 }
 0x1e6   :  { %773 = vst [vmem:[%s2287_s7 + $0x8] sm:$0xff] %v769_v1  ;;  %1533 = vmatmul.mubr.bf16.vlgmr.msra.gmra.mxu0 %v860_v2  ;;  %1938 = vmatprep.mubr.msk.bf16.mxu1 %vm2099_vm0, %v2098_v0 }
 0x1e7   :  { %1923 = vmatpush3.bf16.msra.mxu1 %v2020_v14 }
 0x1e8   :  { %1924 = vmatprep.subr.bf16.mxu1 %v2098_v0 }
 0x1eb   :  { %1925 = vmatpush3.bf16.msra.mxu1 %v2021_v3 }
 0x1ec   :  { %1926 = vmatprep.subr.bf16.mxu1 %v2098_v0 }
 0x1ef   :  { %1927 = vmatpush3.bf16.msra.mxu1 %v2022_v4 }
 0x1f0   :  { %1928 = vmatprep.subr.bf16.mxu1 %v2098_v0 }
 0x1f3   :  { %1929 = vmatpush3.bf16.msra.mxu1 %v2023_v51 }
 0x1f4   :  { %1930 = vmatprep.subr.bf16.mxu1 %v2098_v0 }
 0x1f7   :  { %1931 = vmatpush3.bf16.msra.mxu1 %v2024_v5 }
 0x1f8   :  { %1932 = vmatprep.subr.bf16.mxu1 %v2098_v0 }
 0x1fb   :  { %1933 = vmatpush3.bf16.msra.mxu1 %v2025_v6 }
 0x1fc   :  { %1934 = vmatprep.subr.bf16.mxu1 %v2098_v0 }
 0x1ff   :  { %1935 = vmatpush3.bf16.msra.mxu1 %v2026_v7 }
 0x200   :  { %1936 = vmatprep.subr.bf16.mxu1 %v2098_v0 }
 0x203   :  { %1937 = vmatpush3.bf16.msra.mxu1 %v2027_v8 }
 0x285   :  { %v1833_v9 = vpop.f32.mrf.mxu1 }
 0x286   :  { %v1855_v10 = vpop.f32.mrf.mxu0 }
 0x287   :  { %v1834_v11 = vpop.f32.mrf.mxu1 }
 0x288   :  { %v1856_v12 = vpop.f32.mrf.mxu0  ;;  %v1835_v17 = vadd.f32 %v1834_v11, %v1833_v9 }
 0x289   :  { %v1836_v13 = vpop.f32.mrf.mxu1  ;;  %v1857_v20 = vadd.f32 %v1856_v12, %v1855_v10 }
 0x28a   :  { %v1858_v54 = vpop.f32.mrf.mxu0  ;;  %v1415_v19 = vadd.f32 %v1835_v17, %v1739_v18 }
 0x28b   :  { %v1837_v15 = vpop.f32.mrf.mxu1 }
 0x28c   :  { %v1859_v16 = vpop.f32.mrf.mxu0  ;;  %v1455_v23 = vadd.f32 %v1857_v20, %v1415_v19 }
 0x2a5   :  { %v1877_v0 = vpop.f32.mrf.mxu1 }
 0x2a6   :  { %v1899_v21 = vpop.f32.mrf.mxu0 }
 0x2a7   :  { %v1878_v22 = vpop.f32.mrf.mxu1 }
 0x2a8   :  { %v1879_v24 = vadd.f32 %v1878_v22, %v1877_v0  ;;  %v1900_v26 = vpop.f32.mrf.mxu0 }
 0x2a9   :  { %v1880_v27 = vpop.f32.mrf.mxu1  ;;  %v1901_v29 = vadd.f32 %v1900_v26, %v1899_v21 }
 0x2aa   :  { %v1495_v28 = vadd.f32 %v1879_v24, %v1455_v23  ;;  %v1902_v30 = vpop.f32.mrf.mxu0 }
 0x2ab   :  { %v1881_v31 = vpop.f32.mrf.mxu1 }
 0x2ac   :  { %v1535_v25 = vadd.f32 %v1901_v29, %v1495_v28  ;;  %v1903_v32 = vpop.f32.mrf.mxu0 }
 0x2ae   :  { %vm1540_vm4 = vcmp.gt.f32.partialorder %v1535_v25, 0.0  ;;  %v1541_v33 = vmul.f32 0.2, %v1535_v25 }
 0x2b0   :  { %v1542_v34 = vsel %vm1540_vm4, %v1535_v25, %v1541_v33 }
 0x2b1   :  { %v1543_v35 = vpack.c.bf16 %v1542_v34, %v1542_v34 }
 0x2b3   :  { %1939 = vmatmul.mubr.bf16.vlgmr.msra.gmra.mxu1 %v1543_v35 }
 0x373   :  { %v1648_v37 = vpop.f32.mrf.mxu1 }
 0x374   :  { %v1649_v38 = vadd.f32 %v1804_v36, %v1648_v37 }
 0x375   :  { %v1940_v39 = vpop.f32.mrf.mxu1 }
 0x376   :  { %v1813_v40 = vmul.f32 -1.442695, %v1649_v38 }
 0x377   :  { %v1651_v41 = vpop.f32.mrf.mxu1 }
 0x378   :  { %2044 = vpow2.f32 %v1813_v40 }
 0x379   :  { %v1941_v42 = vpop.f32.mrf.mxu1 }
 0x385   :  { %v2045_v43 = vpop.eup %2044 }
 0x386   :  { %v1657_v44 = vadd.f32 1.0, %v2045_v43 }
 0x388   :  { %2046 = vrcp.f32 %v1657_v44 }
 0x395   :  { %v2047_v45 = vpop.eup %2046 }
 0x396   :  { %1660 = vst [vmem:[%s2288_s8] sm:$0x3f] %v2047_v45 }
 0x397   :  { %1669 = vsyncpa [#allocation3], 1 }
 0x398   :  { %1670 = vsyncpa [#allocation5], 1 }

</bundles_post_ra>
